<compile_context>
chip_gen: v6e
topology: v6e:2x2x1
jax: 0.10.0
libtpu: 0.0.40
codegen_flags: <defaults>
</compile_context>

<pallas_src>
import functools
import math

import jax
import jax.numpy as jnp
from jax import lax
from jax.experimental import pallas as pl
from jax.experimental.pallas import tpu as pltpu

NEG = -1.0e30  # plain Python float; never a traced constant inside the kernel


# ---------------------------------------------------------------------------
# Fused kernel: linear classifier + cross-entropy + accuracy, reduced in-kernel
# ---------------------------------------------------------------------------
def speaker_criterion_kernel(x_ref, w_ref, b_ref, lab_ref,
                             loss_ref, acc_ref, *, n_classes, n_batch):
    i = pl.program_id(0)
    tm = x_ref.shape[0]
    c_pad = w_ref.shape[1]

    # output-resident scalar accumulators (same (0,0) block for every grid step)
    @pl.when(i == 0)
    def _():
        loss_ref[...] = jnp.zeros_like(loss_ref)
        acc_ref[...] = jnp.zeros_like(acc_ref)

    # logits: [TM, C_pad]; bf16 operands, f32 accumulation on the MXU
    logits = jnp.dot(x_ref[...], w_ref[...],
                     preferred_element_type=jnp.float32) + b_ref[...]

    lane = lax.broadcasted_iota(jnp.int32, logits.shape, 1)
    logits = jnp.where(lane < n_classes, logits, NEG)   # mask padded class lanes

    # log-sum-exp over the (masked) class dimension
    m = jnp.max(logits, axis=-1, keepdims=True)                              # [TM,1]
    lse = m + jnp.log(jnp.sum(jnp.exp(logits - m), axis=-1, keepdims=True))  # [TM,1]

    # logit at the target label via a lane-equality mask (no lane gather)
    # NOTE: labels are assumed to lie in [0, n_classes); out-of-range labels
    # silently contribute lab_logit=0 instead of erroring like torch CE loss.
    lab = lab_ref[...]                                                       # [TM,1]
    lab_logit = jnp.sum(jnp.where(lane == lab, logits, 0.0),
                        axis=-1, keepdims=True)
    per_loss = lse - lab_logit                      # = -log_softmax(logits)[label]

    # argmax over classes: smallest index attaining the max (PyTorch max(1)[1])
    pred = jnp.min(jnp.where(logits == m, lane, c_pad), axis=-1, keepdims=True)
    per_corr = (pred == lab).astype(jnp.float32)                             # [TM,1]

    # mask padded batch rows, then accumulate the batch sums in place
    row = lax.broadcasted_iota(jnp.int32, (tm, 1), 0) + i * tm
    row_valid = (row < n_batch).astype(jnp.float32)

    loss_ref[...] += jnp.sum(per_loss * row_valid)
    acc_ref[...] += jnp.sum(per_corr * row_valid)

    # final step: turn the masked sums into means over the real batch
    @pl.when(i == pl.num_programs(0) - 1)
    def _():
        loss_ref[...] = loss_ref[...] * (1.0 / n_batch)
        acc_ref[...] = acc_ref[...] * (1.0 / n_batch)


# ---------------------------------------------------------------------------
# One-time parameter prep (outside the per-step path; cache the result)
# ---------------------------------------------------------------------------
def prepare_speaker_classifier_params(weight, bias):
    """weight: [nSpeakers, dimEncoder] (PyTorch Linear layout), bias: [nSpeakers].

    Transposes to (H, C_pad) with lane-dense class padding, casts the weight to
    bf16 (matmul accumulates in f32 in-kernel), keeps the bias in f32.
    """
    C, H = weight.shape
    C_pad = ((C + 127) // 128) * 128
    W = jnp.zeros((H, C_pad), jnp.bfloat16).at[:, :C].set(weight.T.astype(jnp.bfloat16))
    b = jnp.zeros((1, C_pad), jnp.float32).at[:, :C].set(
        bias.reshape(1, C).astype(jnp.float32))
    return W, b


# ---------------------------------------------------------------------------
# Forward wrapper
# ---------------------------------------------------------------------------
def speaker_criterion_forward(cFeature, otherEncoded, label, W, b, n_classes):
    """Returns (loss, acc), each shaped (1, 1) like the PyTorch .view(1, -1)."""
    del otherEncoded                                 # unused by the reference forward
    B, _, H = cFeature.shape
    C_pad = W.shape[1]

    # Row tile: one grid step for typical CPC batch sizes, 256-row blocks otherwise
    # (batch axis is a sequential accumulation -> "arbitrary").
    B8 = ((B + 7) // 8) * 8
    TM = B8 if B8 <= 512 else 256
    B_pad = ((B + TM - 1) // TM) * TM

    x = cFeature[:, -1, :].astype(jnp.bfloat16)                      # [B, H]
    x = jnp.pad(x, ((0, B_pad - B), (0, 0)))                         # [B_pad, H]
    lab = jnp.zeros((B_pad, 1), jnp.int32).at[:B, 0].set(label.astype(jnp.int32))

    # VMEM budget: double-buffered inputs + live f32 logits + headroom
    # (the resident (H, C_pad) weight is what can exceed v7x's 32 MiB default).
    vmem_est = 2 * (TM * H * 2 + H * C_pad * 2 + C_pad * 4 + TM * 4) + 4 * TM * C_pad * 4
    vmem_limit = int(min(max(vmem_est + (8 << 20), 32 << 20), 64 << 20))

    # TODO(synk): for very large nSpeakers, add an inner "arbitrary" grid axis over
    # class chunks (tk ~ 512-1024 lanes) with online max/sum-exp/argmin accumulators
    # instead of a single resident (H, C_pad) weight block.
    kernel = functools.partial(speaker_criterion_kernel,
                               n_classes=n_classes, n_batch=B)
    loss, acc = pl.pallas_call(
        kernel,
        out_shape=(jax.ShapeDtypeStruct((1, 1), jnp.float32),
                   jax.ShapeDtypeStruct((1, 1), jnp.float32)),
        grid=(B_pad // TM,),
        in_specs=[
            pl.BlockSpec((TM, H), lambda i: (i, 0)),        # features (row-tiled)
            pl.BlockSpec((H, C_pad), lambda i: (0, 0)),     # weights (resident, bf16)
            pl.BlockSpec((1, C_pad), lambda i: (0, 0)),     # bias (resident, f32)
            pl.BlockSpec((TM, 1), lambda i: (i, 0)),        # labels (row-tiled)
        ],
        out_specs=(
            pl.BlockSpec((1, 1), lambda i: (0, 0)),         # resident scalar accum
            pl.BlockSpec((1, 1), lambda i: (0, 0)),
        ),
        compiler_params=pltpu.CompilerParams(
            dimension_semantics=("arbitrary",),
            vmem_limit_bytes=vmem_limit),
    )(x, W, b, lab)

    return loss, acc


if __name__ == "__main__":
    B, S, H, n_speakers = 2, 8, 32, 10               # dimEncoder=32, nSpeakers=10
    key = jax.random.PRNGKey(0)
    k1, k2, k3, k4, k5 = jax.random.split(key, 5)

    # Deterministic Linear(dimEncoder, nSpeakers) init (PyTorch-style uniform).
    bound = 1.0 / math.sqrt(H)
    weight = jax.random.uniform(k1, (n_speakers, H), jnp.float32, -bound, bound)
    bias = jax.random.uniform(k2, (n_speakers,), jnp.float32, -bound, bound)

    cFeature = jax.random.normal(k3, (B, S, H), jnp.float32)
    otherEncoded = jax.random.normal(k4, (B, S, H), jnp.float32)  # unused in forward
    label = jax.random.randint(k5, (B,), 0, n_speakers, jnp.int32)

    # One-time parameter prep (transpose + pad + bf16 cast), cached like a parameter.
    W, b = prepare_speaker_classifier_params(weight, bias)

    fwd = jax.jit(functools.partial(speaker_criterion_forward, n_classes=n_speakers))
    loss, acc = fwd(cFeature, otherEncoded, label, W, b)
    jax.block_until_ready((loss, acc))

    # Pure-JAX f32 reference (PyTorch semantics); loose tol for the bf16 matmul.
    xf = cFeature[:, -1, :]
    logits = xf @ weight.T + bias
    ref_loss = jnp.mean(jax.nn.logsumexp(logits, axis=-1)
                        - jnp.take_along_axis(logits, label[:, None], axis=-1)[:, 0])
    ref_acc = jnp.mean((jnp.argmax(logits, axis=-1) == label).astype(jnp.float32))
    assert abs(float(loss[0, 0]) - float(ref_loss)) < 5e-2, (loss, ref_loss)
    assert abs(float(acc[0, 0]) - float(ref_acc)) < 1e-6, (acc, ref_acc)

    print("KERNEL_OK")
</pallas_src>

<mosaic_0001>
module attributes {stable_mosaic.version = 11 : i64} {
  func.func @speaker_criterion_kernel(%arg0: i32, %arg1: memref<8x32xbf16, #tpu.memory_space<vmem>>, %arg2: memref<32x128xbf16, #tpu.memory_space<vmem>>, %arg3: memref<1x128xf32, #tpu.memory_space<vmem>>, %arg4: memref<8x1xi32, #tpu.memory_space<vmem>>, %arg5: memref<1x1xf32, #tpu.memory_space<vmem>>, %arg6: memref<1x1xf32, #tpu.memory_space<vmem>>) attributes {dimension_semantics = [#tpu.dimension_semantics<arbitrary>], iteration_bounds = array<i64: 1>, scalar_prefetch = 0 : i64, scratch_operands = 0 : i64, tpu.core_type = #tpu.core_type<tc>, window_params = [{transform_indices = @transform_0, window_bounds = array<i64: 8, 32>}, {pipeline_mode = #tpu.pipeline_mode<synchronous>, transform_indices = @transform_1, window_bounds = array<i64: 32, 128>}, {pipeline_mode = #tpu.pipeline_mode<synchronous>, transform_indices = @transform_2, window_bounds = array<i64: 1, 128>}, {transform_indices = @transform_3, window_bounds = array<i64: 8, 1>}, {pipeline_mode = #tpu.pipeline_mode<synchronous>, transform_indices = @transform_4, window_bounds = array<i64: 1, 1>}, {pipeline_mode = #tpu.pipeline_mode<synchronous>, transform_indices = @transform_5, window_bounds = array<i64: 1, 1>}]} {
    %c0_i32 = arith.constant 0 : i32
    %0 = arith.cmpi eq, %arg0, %c0_i32 : i32
    %1 = arith.extui %0 : i1 to i32
    %c0_i32_0 = arith.constant 0 : i32
    %2 = arith.cmpi ne, %1, %c0_i32_0 : i32
    scf.if %2 {
      %cst_26 = arith.constant 0.000000e+00 : f32
      %69 = vector.broadcast %cst_26 : f32 to vector<1x1xf32>
      %c0_27 = arith.constant 0 : index
      %c0_28 = arith.constant 0 : index
      %70 = vector.load %arg5[%c0_27, %c0_28] : memref<1x1xf32, #tpu.memory_space<vmem>>, vector<1x1xf32>
      tpu.vector_store %arg5[%c0_27, %c0_28], %69 {strides = array<i32>} : memref<1x1xf32, #tpu.memory_space<vmem>>, vector<1x1xf32>,
      %cst_29 = arith.constant 0.000000e+00 : f32
      %71 = vector.broadcast %cst_29 : f32 to vector<1x1xf32>
      %c0_30 = arith.constant 0 : index
      %c0_31 = arith.constant 0 : index
      %72 = vector.load %arg6[%c0_30, %c0_31] : memref<1x1xf32, #tpu.memory_space<vmem>>, vector<1x1xf32>
      tpu.vector_store %arg6[%c0_30, %c0_31], %71 {strides = array<i32>} : memref<1x1xf32, #tpu.memory_space<vmem>>, vector<1x1xf32>,
    } else {
    }
    %c0 = arith.constant 0 : index
    %c0_1 = arith.constant 0 : index
    %3 = vector.load %arg1[%c0, %c0_1] : memref<8x32xbf16, #tpu.memory_space<vmem>>, vector<8x32xbf16>
    %c0_2 = arith.constant 0 : index
    %c0_3 = arith.constant 0 : index
    %4 = vector.load %arg2[%c0_2, %c0_3] : memref<32x128xbf16, #tpu.memory_space<vmem>>, vector<32x128xbf16>
    %cst = arith.constant dense<0.000000e+00> : vector<8x128xf32>
    %5 = tpu.matmul %3, %4, %cst {dimension_numbers = #tpu.dot_dimension_numbers<[1], [0], [0], [1], [0, 0, 1, 1], [], []>} : vector<8x32xbf16>, vector<32x128xbf16>, vector<8x128xf32> -> vector<8x128xf32>
    %c0_4 = arith.constant 0 : index
    %c0_5 = arith.constant 0 : index
    %6 = vector.load %arg3[%c0_4, %c0_5] : memref<1x128xf32, #tpu.memory_space<vmem>>, vector<1x128xf32>
    %7 = vector.broadcast %6 : vector<1x128xf32> to vector<8x128xf32>
    %8 = arith.addf %5, %7 : vector<8x128xf32>
    %9 = tpu.iota {dimensions = array<i32: 1>} : vector<8x128xi32>
    %c10_i32 = arith.constant 10 : i32
    %10 = vector.broadcast %c10_i32 : i32 to vector<8x128xi32>
    %11 = arith.cmpi slt, %9, %10 : vector<8x128xi32>
    %cst_6 = arith.constant -1.000000e+30 : f32
    %12 = vector.broadcast %cst_6 : f32 to vector<8x128xf32>
    %13 = arith.select %11, %8, %12 : vector<8x128xi1>, vector<8x128xf32>
    %cst_7 = arith.constant dense<0xFF800000> : vector<8xf32>
    %14 = vector.multi_reduction <maximumf>, %13, %cst_7 [1] : vector<8x128xf32> to vector<8xf32>
    %15 = vector.shape_cast %14 : vector<8xf32> to vector<8x1xf32>
    %16 = vector.broadcast %15 : vector<8x1xf32> to vector<8x128xf32>
    %17 = arith.subf %13, %16 : vector<8x128xf32>
    %18 = math.exp %17 : vector<8x128xf32>
    %cst_8 = arith.constant dense<0.000000e+00> : vector<8xf32>
    %19 = vector.multi_reduction <add>, %18, %cst_8 [1] : vector<8x128xf32> to vector<8xf32>
    %20 = vector.shape_cast %19 : vector<8xf32> to vector<8x1xf32>
    %21 = math.log %20 : vector<8x1xf32>
    %22 = arith.addf %15, %21 : vector<8x1xf32>
    %c0_9 = arith.constant 0 : index
    %c0_10 = arith.constant 0 : index
    %23 = vector.load %arg4[%c0_9, %c0_10] : memref<8x1xi32, #tpu.memory_space<vmem>>, vector<8x1xi32>
    %24 = vector.broadcast %23 : vector<8x1xi32> to vector<8x128xi32>
    %25 = arith.cmpi eq, %9, %24 : vector<8x128xi32>
    %cst_11 = arith.constant 0.000000e+00 : f32
    %26 = vector.broadcast %cst_11 : f32 to vector<8x128xf32>
    %27 = arith.select %25, %13, %26 : vector<8x128xi1>, vector<8x128xf32>
    %cst_12 = arith.constant dense<0.000000e+00> : vector<8xf32>
    %28 = vector.multi_reduction <add>, %27, %cst_12 [1] : vector<8x128xf32> to vector<8xf32>
    %29 = vector.shape_cast %28 : vector<8xf32> to vector<8x1xf32>
    %30 = arith.subf %22, %29 : vector<8x1xf32>
    %31 = vector.broadcast %15 : vector<8x1xf32> to vector<8x128xf32>
    %32 = arith.cmpf oeq, %13, %31 : vector<8x128xf32>
    %c128_i32 = arith.constant 128 : i32
    %33 = vector.broadcast %c128_i32 : i32 to vector<8x128xi32>
    %34 = arith.select %32, %9, %33 : vector<8x128xi1>, vector<8x128xi32>
    %cst_13 = arith.constant dense<2147483647> : vector<8xi32>
    %35 = vector.multi_reduction <minsi>, %34, %cst_13 [1] : vector<8x128xi32> to vector<8xi32>
    %36 = vector.shape_cast %35 : vector<8xi32> to vector<8x1xi32>
    %37 = arith.cmpi eq, %36, %23 : vector<8x1xi32>
    %38 = arith.extui %37 : vector<8x1xi1> to vector<8x1xi32>
    %39 = arith.sitofp %38 : vector<8x1xi32> to vector<8x1xf32>
    %40 = tpu.iota {dimensions = array<i32: 0>} : vector<8x1xi32>
    %c8_i32 = arith.constant 8 : i32
    %41 = arith.muli %arg0, %c8_i32 : i32
    %42 = vector.broadcast %41 : i32 to vector<8x1xi32>
    %43 = arith.addi %40, %42 : vector<8x1xi32>
    %c2_i32 = arith.constant 2 : i32
    %44 = vector.broadcast %c2_i32 : i32 to vector<8x1xi32>
    %45 = arith.cmpi slt, %43, %44 : vector<8x1xi32>
    %46 = arith.extui %45 : vector<8x1xi1> to vector<8x1xi32>
    %47 = arith.sitofp %46 : vector<8x1xi32> to vector<8x1xf32>
    %c0_14 = arith.constant 0 : index
    %c0_15 = arith.constant 0 : index
    %48 = vector.load %arg5[%c0_14, %c0_15] : memref<1x1xf32, #tpu.memory_space<vmem>>, vector<1x1xf32>
    %49 = arith.mulf %30, %47 : vector<8x1xf32>
    %50 = vector.shape_cast %49 : vector<8x1xf32> to vector<1x8x1xf32>
    %cst_16 = arith.constant dense<0.000000e+00> : vector<1xf32>
    %51 = vector.multi_reduction <add>, %50, %cst_16 [1, 2] : vector<1x8x1xf32> to vector<1xf32>
    %52 = vector.shape_cast %51 : vector<1xf32> to vector<1x1x1xf32>
    %53 = vector.extract %52[0, 0, 0] : f32 from vector<1x1x1xf32>
    %54 = vector.broadcast %53 : f32 to vector<1x1xf32>
    %55 = arith.addf %48, %54 : vector<1x1xf32>
    %c0_17 = arith.constant 0 : index
    %c0_18 = arith.constant 0 : index
    %56 = vector.load %arg5[%c0_17, %c0_18] : memref<1x1xf32, #tpu.memory_space<vmem>>, vector<1x1xf32>
    tpu.vector_store %arg5[%c0_17, %c0_18], %55 {strides = array<i32>} : memref<1x1xf32, #tpu.memory_space<vmem>>, vector<1x1xf32>,
    %c0_19 = arith.constant 0 : index
    %c0_20 = arith.constant 0 : index
    %57 = vector.load %arg6[%c0_19, %c0_20] : memref<1x1xf32, #tpu.memory_space<vmem>>, vector<1x1xf32>
    %58 = arith.mulf %39, %47 : vector<8x1xf32>
    %59 = vector.shape_cast %58 : vector<8x1xf32> to vector<1x8x1xf32>
    %cst_21 = arith.constant dense<0.000000e+00> : vector<1xf32>
    %60 = vector.multi_reduction <add>, %59, %cst_21 [1, 2] : vector<1x8x1xf32> to vector<1xf32>
    %61 = vector.shape_cast %60 : vector<1xf32> to vector<1x1x1xf32>
    %62 = vector.extract %61[0, 0, 0] : f32 from vector<1x1x1xf32>
    %63 = vector.broadcast %62 : f32 to vector<1x1xf32>
    %64 = arith.addf %57, %63 : vector<1x1xf32>
    %c0_22 = arith.constant 0 : index
    %c0_23 = arith.constant 0 : index
    %65 = vector.load %arg6[%c0_22, %c0_23] : memref<1x1xf32, #tpu.memory_space<vmem>>, vector<1x1xf32>
    tpu.vector_store %arg6[%c0_22, %c0_23], %64 {strides = array<i32>} : memref<1x1xf32, #tpu.memory_space<vmem>>, vector<1x1xf32>,
    %c0_i32_24 = arith.constant 0 : i32
    %66 = arith.cmpi eq, %arg0, %c0_i32_24 : i32
    %67 = arith.extui %66 : i1 to i32
    %c0_i32_25 = arith.constant 0 : i32
    %68 = arith.cmpi ne, %67, %c0_i32_25 : i32
    scf.if %68 {
      %c0_26 = arith.constant 0 : index
      %c0_27 = arith.constant 0 : index
      %69 = vector.load %arg5[%c0_26, %c0_27] : memref<1x1xf32, #tpu.memory_space<vmem>>, vector<1x1xf32>
      %cst_28 = arith.constant 5.000000e-01 : f32
      %70 = vector.broadcast %cst_28 : f32 to vector<1x1xf32>
      %71 = arith.mulf %69, %70 : vector<1x1xf32>
      %c0_29 = arith.constant 0 : index
      %c0_30 = arith.constant 0 : index
      %72 = vector.load %arg5[%c0_29, %c0_30] : memref<1x1xf32, #tpu.memory_space<vmem>>, vector<1x1xf32>
      tpu.vector_store %arg5[%c0_29, %c0_30], %71 {strides = array<i32>} : memref<1x1xf32, #tpu.memory_space<vmem>>, vector<1x1xf32>,
      %c0_31 = arith.constant 0 : index
      %c0_32 = arith.constant 0 : index
      %73 = vector.load %arg6[%c0_31, %c0_32] : memref<1x1xf32, #tpu.memory_space<vmem>>, vector<1x1xf32>
      %cst_33 = arith.constant 5.000000e-01 : f32
      %74 = vector.broadcast %cst_33 : f32 to vector<1x1xf32>
      %75 = arith.mulf %73, %74 : vector<1x1xf32>
      %c0_34 = arith.constant 0 : index
      %c0_35 = arith.constant 0 : index
      %76 = vector.load %arg6[%c0_34, %c0_35] : memref<1x1xf32, #tpu.memory_space<vmem>>, vector<1x1xf32>
      tpu.vector_store %arg6[%c0_34, %c0_35], %75 {strides = array<i32>} : memref<1x1xf32, #tpu.memory_space<vmem>>, vector<1x1xf32>,
    } else {
    }
    return
  }
  func.func @transform_0(%arg0: i32) -> (i32, i32) {
    %c0_i32 = arith.constant 0 : i32
    %c0_i32_0 = arith.constant 0 : i32
    return %arg0, %c0_i32 : i32, i32
  }
  func.func @transform_1(%arg0: i32) -> (i32, i32) {
    %c0_i32 = arith.constant 0 : i32
    %c0_i32_0 = arith.constant 0 : i32
    %c0_i32_1 = arith.constant 0 : i32
    return %c0_i32, %c0_i32_0 : i32, i32
  }
  func.func @transform_2(%arg0: i32) -> (i32, i32) {
    %c0_i32 = arith.constant 0 : i32
    %c0_i32_0 = arith.constant 0 : i32
    %c0_i32_1 = arith.constant 0 : i32
    return %c0_i32, %c0_i32_0 : i32, i32
  }
  func.func @transform_3(%arg0: i32) -> (i32, i32) {
    %c0_i32 = arith.constant 0 : i32
    %c0_i32_0 = arith.constant 0 : i32
    return %arg0, %c0_i32 : i32, i32
  }
  func.func @transform_4(%arg0: i32) -> (i32, i32) {
    %c0_i32 = arith.constant 0 : i32
    %c0_i32_0 = arith.constant 0 : i32
    %c0_i32_1 = arith.constant 0 : i32
    return %c0_i32, %c0_i32_0 : i32, i32
  }
  func.func @transform_5(%arg0: i32) -> (i32, i32) {
    %c0_i32 = arith.constant 0 : i32
    %c0_i32_0 = arith.constant 0 : i32
    %c0_i32_1 = arith.constant 0 : i32
    return %c0_i32, %c0_i32_0 : i32, i32
  }
}

</mosaic_0001>

<bundles_post_ra>
// kernel: speaker_criterion_forward.1
= control target key start
LH: loop header
LB: loop body
LE: loop exit
PB: predicated region body
PF: predicated region fallthrough
CT: control target
= control target key end

     0   :  { %11 = vsyncpa [#allocation3], 0  ;;  %v294_v1 = vmov 0.0   ;;  %vm295_vm0 = vmmov 0   ;;  %v296_v4 = vmov 0   ;;  %s363_s0 = inlined_call_operand.vmem [shape: bf16[8,32], index: 0, kind: input, shape index: {}]   ;;  %s364_s1 = inlined_call_operand.vmem [shape: bf16[32,128], index: 1, kind: input, shape index: {}]   ;;  %s365_s2 = inlined_call_operand.vmem [shape: f32[1,128], index: 2, kind: input, shape index: {}]   ;;  %s366_s3 = inlined_call_operand.vmem [shape: s32[8,1], index: 3, kind: input, shape index: {}]   ;;  %s367_s4 = inlined_call_operand.hbm [shape: f32[1,1], index: 4, kind: output, shape index: {0}]   ;;  %s368_s5 = inlined_call_operand.hbm [shape: f32[1,1], index: 5, kind: output, shape index: {1}]  }
   0x1   :  { %v244_v0 = vld [vmem:[%s364_s1 + $0x8] sm:$0xff]   ;;  %225 = vmatprep.subr.bf16.mxu0 %v294_v1  ;;  %v245_v2 = vld [vmem:[%s364_s1] sm:$0xff]   ;;  %229 = vmatprep.mubr.msk.bf16.mxu0 %vm295_vm0, %v294_v1 }
   0x2   :  { %226 = vmatpush3.bf16.msra.mxu0 %v244_v0  ;;  %v111_v3 = vld [vmem:[%s366_s3] sm:$0xff]  ;;  %242 = vset.pattern.permute.xlu1 %v296_v4 }
   0x3   :  { %227 = vmatprep.subr.bf16.mxu0 %v294_v1 }
   0x4   :  { %12 = vsyncpa [#allocation5], 0  ;;  %113 = vperm.xlu1 %242, %v111_v3   ;;  %243 = vset.pattern.permute.xlu0 %v296_v4  ;;  %v29_v5 = vld [vmem:[%s363_s0] sm:$0xf]  ;;  %vm53_vm1 = vcmask 261120   ;;  %v97_v6 = vlaneseq  ;;  %vm149_vm8 = vcmask 7168  }
   0x5   :  { %v216_v8 = vld [vmem:[%s365_s2] ss:$0 sm:$0xff]  ;;  %vm26_vm9 = vcmask 0   ;;  %s297_s3 = smov [#allocation2]   ;;  %s298_s28 = smov [#allocation4]  }
   0x6   :  { %228 = vmatpush3.bf16.msra.mxu0 %v245_v2  ;;  %v98_v7 = vand.u32 127, %v97_v6  ;;  %v140_v31 = vshrl.u32 %v97_v6, 7  ;;  %27 = vst.msk [vmem:[#allocation2] sm:$0x1] %vm26_vm9, %v294_v1  ;;  %28 = vst.msk [vmem:[#allocation4] sm:$0x1] %vm26_vm9, %v294_v1 }
   0x7   :  { %s194_s27 = sshll.u32 %s297_s3, 4  ;;  %s204_s29 = sshll.u32 %s298_s28, 4  ;;  %s195_s27 = int_to_ptr.vmem [resolvable:$true] %s194_s27  ;;  %s205_s29 = int_to_ptr.vmem [resolvable:$true] %s204_s29 }
   0x8   :  { %vm99_vm2 = vcmp.lt.s32.totalorder %v98_v7, 10  ;;  %vm144_vm6 = vcmp.lt.s32.totalorder %v140_v31, 2  ;;  %s250_s30 = scalar_lea.vmem %s195_s27, 16  ;;  %s254_s6 = scalar_lea.vmem %s195_s27, 32 }
   0x9   :  { %230 = vmatmul.mubr.msk.bf16.vlgmr.msra.gmra.mxu0 %vm53_vm1, %v29_v5  ;;  %v221_v39 = vsel %vm144_vm6, 1.0, %v294_v1  ;;  %p251_p0 = scmp.ne.s32.totalorder %s195_s27, %s250_s30  ;;  %p255_p1 = scmp.lt.s32.totalorder %s195_s27, %s195_s27 }
   0xa   :  { %p256_p2 = scmp.lt.s32.totalorder %s254_s6, %s250_s30 }
   0xc   :  { %p257_p3 = por %p256_p2, %p255_p1 }
   0xd   :  { %v147_v60 = vld [vmem:[#allocation2] sm:$0x1]  ;;  %v164_v63 = vld [vmem:[#allocation4] sm:$0x1] }
   0xe   :  { %p258_p4 = pnand %p257_p3, %p251_p0 }
  0x7f   :  { %v114_v23 = vpop.permute.xlu1 %113 }
  0x80   :  { %vm115_vm5 = vcmp.eq.s32.totalorder %v98_v7, %v114_v23 }
  0xc9   :  { %v91_v9 = vpop.f32.mrf.mxu0 }
  0xca   :  { %v92_v10 = vadd.f32 %v216_v8, %v91_v9 }
  0xcb   :  { %v231_v11 = vpop.f32.mrf.mxu0 }
  0xcc   :  { %v100_v12 = vsel %vm99_vm2, %v92_v10, -1e+30 }
  0xcd   :  { %101 = vmax.xlane.f32.xlu0 %v100_v12  ;;  %v94_v13 = vpop.f32.mrf.mxu0  ;;  %v116_v27 = vsel %vm115_vm5, %v100_v12, 0.0 }
  0xcf   :  { %v232_v14 = vpop.f32.mrf.mxu0 }
 0x156   :  { %v102_v15 = vpop.xlane.xlu0 %101 }
 0x157   :  { %v103_v16 = vsub.f32 %v100_v12, %v102_v15  ;;  %vm120_vm3 = vcmp.eq.f32.partialorder %v100_v12, %v102_v15 }
 0x158   :  { %v121_v17 = vsel %vm120_vm3, %v98_v7, 128 }
 0x159   :  { %v104_v18 = vmul.f32 1.442695, %v103_v16  ;;  %v123_v19 = vshra.s32 %v121_v17, 16  ;;  %v122_v22 = vand.u32 65535, %v121_v17 }
 0x15b   :  { %246 = vpow2.f32 %v104_v18  ;;  %v125_v20 = vcvt.s32.f32 %v123_v19  ;;  %v124_v25 = vcvt.s32.f32 %v122_v22 }
 0x15d   :  { %126 = vmin.xlane.f32.xlu0 %v125_v20 }
 0x168   :  { %v247_v21 = vpop.eup %246 }
 0x169   :  { %106 = vadd.xlane.f32.xlu1 %v247_v21 }
 0x1e6   :  { %v127_v24 = vpop.xlane.xlu0 %126 }
 0x1e7   :  { %vm128_vm4 = vcmp.eq.f32.partialorder %v125_v20, %v127_v24  ;;  %v133_v30 = vcvt.f32.s32 %v127_v24 }
 0x1e8   :  { %v129_v26 = vsel %vm128_vm4, %v124_v25, inf }
 0x1e9   :  { %130 = vmin.xlane.f32.xlu0 %v129_v26  ;;  %v134_v34 = vshll.u32 %v133_v30, 16 }
 0x1ed   :  { %117 = vadd.xlane.f32.xlu0 %v116_v27 }
 0x1f2   :  { %v107_v28 = vpop.xlane.xlu1 %106 }
 0x1f3   :  { %248 = vlog2.f32 %v107_v28 }
 0x200   :  { %v249_v29 = vpop.eup %248 }
 0x201   :  { %v109_v32 = vmul.f32 0.6931472, %v249_v29 }
 0x203   :  { %v110_v37 = vadd.f32 %v109_v32, %v102_v15 }
 0x272   :  { %v131_v33 = vpop.xlane.xlu0 %130 }
 0x273   :  { %v132_v35 = vcvt.f32.s32 %v131_v33 }
 0x275   :  { %v135_v36 = vadd.s32 %v134_v34, %v132_v35 }
 0x276   :  { %v118_v38 = vpop.xlane.xlu0 %117 }
 0x277   :  { %v119_v40 = vsub.f32 %v110_v37, %v118_v38  ;;  %vm136_vm7 = vcmp.eq.s32.totalorder %v135_v36, %v111_v3 }
 0x278   :  { %v220_v41 = vsel %vm136_vm7, 1.0, %v294_v1 }
 0x279   :  { %v148_v42 = vmul.f32 %v221_v39, %v119_v40  ;;  %v165_v44 = vmul.f32 %v221_v39, %v220_v41 }
 0x27b   :  { %v150_v43 = vsel %vm149_vm8, %v148_v42, 0.0  ;;  %v166_v45 = vsel %vm149_vm8, %v165_v44, 0.0 }
 0x27c   :  { %151 = vadd.xlane.f32.xlu0 %v150_v43 }
 0x280   :  { %167 = vadd.xlane.f32.xlu0 %v166_v45 }
 0x305   :  { %v152_v46 = vpop.xlane.xlu0 %151 }
 0x306   :  { %v153_v47 = vrot.slane %v152_v46, 4 }
 0x308   :  { %v154_v48 = vadd.f32 %v153_v47, %v152_v46 }
 0x309   :  { %v168_v49 = vpop.xlane.xlu0 %167 }
 0x30a   :  { %v155_v50 = vrot.slane %v154_v48, 2  ;;  %v169_v51 = vrot.slane %v168_v49, 4 }
 0x30c   :  { %v170_v52 = vadd.f32 %v169_v51, %v168_v49  ;;  %v156_v53 = vadd.f32 %v155_v50, %v154_v48 }
 0x30e   :  { %v171_v54 = vrot.slane %v170_v52, 2  ;;  %v157_v55 = vrot.slane %v156_v53, 1 }
 0x310   :  { %v172_v56 = vadd.f32 %v171_v54, %v170_v52  ;;  %v158_v57 = vadd.f32 %v157_v55, %v156_v53 }
 0x312   :  { %233 = vpush %v158_v57  ;;  %v173_v58 = vrot.slane %v172_v56, 1 }
 0x314   :  { %v174_v59 = vadd.f32 %v173_v58, %v172_v56 }
 0x316   :  { %235 = vpush %v174_v59 }
 0x343   :  { %s234_s0 = spop %233 }
 0x344   :  { %v160_v61 = vstv %s234_s0 }
 0x345   :  { %v161_v62 = vadd.f32 %v160_v61, %v147_v60 }
 0x347   :  { %163 = vst.msk [vmem:[#allocation2] sm:$0x1] %vm26_vm9, %v161_v62  ;;  %s236_s2 = spop %235 }
 0x348   :  { %v176_v0 = vstv %s236_s2 }
 0x349   :  { %v177_v1 = vadd.f32 %v176_v0, %v164_v63 }
 0x34b   :  { %178 = vst.msk [vmem:[#allocation4] sm:$0x1] %vm26_vm9, %v177_v1 }
 0x34e   :  { %v182_v2 = vld [vmem:[#allocation2] sm:$0x1] }
 0x34f   :  { %v183_v3 = vmul.f32 0.5, %v182_v2 }
 0x351   :  { %184 = vst.msk [vmem:[#allocation2] sm:$0x1] %vm26_vm9, %v183_v3 }
 0x352   :  { %261 = shalt.err (!%p258_p4)
}
 0x353   :  { %197 = dma.vmem_to_hbm [thread:$0]  %s195_s27, 16, %s367_s4, [#allocation3]   ;;  %v185_v4 = vld [vmem:[#allocation4] sm:$0x1] }
 0x354   :  { %v186_v5 = vmul.f32 0.5, %v185_v4  ;;  %s270_s9 = scalar_lea.vmem %s205_s29, 16  ;;  %s274_s10 = scalar_lea.vmem %s205_s29, 32 }
 0x355   :  { %p271_p5 = scmp.ne.s32.totalorder %s205_s29, %s270_s9  ;;  %p275_p6 = scmp.lt.s32.totalorder %s205_s29, %s205_s29 }
 0x356   :  { %187 = vst.msk [vmem:[#allocation4] sm:$0x1] %vm26_vm9, %v186_v5  ;;  %p276_p7 = scmp.lt.s32.totalorder %s274_s10, %s270_s9 }
 0x358   :  { %p277_p8 = por %p276_p7, %p275_p6 }
 0x35a   :  { %p278_p9 = pnand %p277_p8, %p271_p5 }
 0x35c   :  { %281 = shalt.err (!%p278_p9)
}
 0x35d   :  { %207 = dma.vmem_to_hbm [thread:$0]  %s205_s29, 16, %s368_s5, [#allocation5]  }
 0x35e   :  { %290 = dma.done.wait [#allocation3], 16  }
 0x35f   :  { %291 = vsyncadd [#allocation3], 4294967280 }
 0x360   :  { %292 = dma.done.wait [#allocation5], 16  }
 0x361   :  { %293 = vsyncadd [#allocation5], 4294967280 }
 0x362   :  { %214 = vsyncpa [#allocation3], 1 }
 0x363   :  { %215 = vsyncpa [#allocation5], 1 }

</bundles_post_ra>
